<compile_context>
chip_gen: v7x
topology: tpu7x:2x2x1
jax: 0.10.0
libtpu: 0.0.40
codegen_flags: <defaults>
</compile_context>

<pallas_src>
import functools

import jax
import jax.numpy as jnp
from jax.experimental import pallas as pl
from jax.experimental.pallas import tpu as pltpu

HIDDEN = 64
LANES = 128


def _round_up(x, m):
    return (x + m - 1) // m * m


def ppo_fused_kernel(x_ref, w1_ref, b1_ref, w2_ref, b2_ref, wh_ref, bh_ref, out_ref):
    """Feature extractor (2x matmul+tanh) + fused policy/value head (1 matmul)."""
    x = x_ref[...]                                                # (tile, obs) bf16
    h = jnp.dot(x, w1_ref[...], preferred_element_type=jnp.float32) + b1_ref[...]
    h = jnp.tanh(h)                                               # EUP, f32
    h = jnp.dot(h.astype(jnp.bfloat16), w2_ref[...],
                preferred_element_type=jnp.float32) + b2_ref[...]
    h = jnp.tanh(h)
    # fused (policy ++ value) head, lane-padded to 128 output columns -> unmasked vst
    out = jnp.dot(h.astype(jnp.bfloat16), wh_ref[...],
                  preferred_element_type=jnp.float32) + bh_ref[...]
    out_ref[...] = out.astype(out_ref.dtype)


def fuse_params(params):
    """Fold head Linears, concat policy+value heads, pad to 128 lanes, cast to bf16."""
    (w1, b1, w2, b2, w3, b3, w4, b4, w5, b5, w6, b6) = params
    action_size = w4.shape[1]
    # policy head: Linear(64,64) -> Linear(64,A)   (no activation) => single matmul
    wp = w3 @ w4                       # (64, A)
    bp = b3 @ w4 + b4                  # (1, A)
    # value head: Linear(64,64) -> Linear(64,1)
    wv = w5 @ w6                       # (64, 1)
    bv = b5 @ w6 + b6                  # (1, 1)
    wh = jnp.concatenate([wp, wv], axis=1)          # (64, A+1)
    bh = jnp.concatenate([bp, bv], axis=1)          # (1,  A+1)
    out_w = _round_up(action_size + 1, LANES)       # lane-dense output width
    wh = jnp.pad(wh, ((0, 0), (0, out_w - (action_size + 1))))
    bh = jnp.pad(bh, ((0, 0), (0, out_w - (action_size + 1))))
    fused = (w1.astype(jnp.bfloat16), b1.astype(jnp.float32),
             w2.astype(jnp.bfloat16), b2.astype(jnp.float32),
             wh.astype(jnp.bfloat16), bh.astype(jnp.float32))
    return fused, action_size, out_w


@functools.partial(jax.jit, static_argnames=("action_size", "out_w", "tile_b"))
def ppo_forward(x, fused, *, action_size, out_w, tile_b=512):
    """Returns (policy_out, value) for a batch of observations."""
    w1, b1, w2, b2, wh, bh = fused
    B, obs = x.shape
    tile = min(tile_b, _round_up(B, 8))         # batch tile (multiple of 8 sublanes)
    b_pad = _round_up(B, tile)
    x_p = x if b_pad == B else jnp.pad(x, ((0, b_pad - B), (0, 0)))
    x_p = x_p.astype(jnp.bfloat16)

    const = lambda i: (0, 0)                    # weights/biases resident across grid
    out = pl.pallas_call(
        ppo_fused_kernel,
        out_shape=jax.ShapeDtypeStruct((b_pad, out_w), jnp.float32),
        grid=(b_pad // tile,),
        in_specs=[
            pl.BlockSpec((tile, obs), lambda i: (i, 0)),      # x (pipelined over batch)
            pl.BlockSpec((obs, HIDDEN), const),               # w1
            pl.BlockSpec((1, HIDDEN), const),                 # b1
            pl.BlockSpec((HIDDEN, HIDDEN), const),            # w2
            pl.BlockSpec((1, HIDDEN), const),                 # b2
            pl.BlockSpec((HIDDEN, out_w), const),             # fused head W
            pl.BlockSpec((1, out_w), const),                  # fused head b
        ],
        out_specs=pl.BlockSpec((tile, out_w), lambda i: (i, 0)),
        compiler_params=pltpu.CompilerParams(
            dimension_semantics=("parallel",)),               # shard batch over v7x TCs
    )(x_p, w1, b1, w2, b2, wh, bh)

    logits = out[:B, :action_size]
    value = out[:B, action_size:action_size + 1]
    return logits, value


def ppo_apply(x, fused, *, action_size, out_w, continuous_action=False, tile_b=512):
    """Full PPOModel.forward / forward_value semantics (incl. continuous epilogue)."""
    logits, value = ppo_forward(x, fused, action_size=action_size,
                                out_w=out_w, tile_b=tile_b)
    if continuous_action:
        half = action_size // 2
        mean, log_std = logits[:, :half], logits[:, half:]
        log_std = jnp.clip(log_std, -20.0, 2.0)
        return (mean, jnp.exp(log_std)), value
    return logits, value


def init_params(key, obs_size, action_size, hidden=HIDDEN):
    """Deterministic synthetic parameters (shapes match PPOModel.__init__)."""
    ks = jax.random.split(key, 12)

    def lin(kw, kb, fan_in, fan_out):
        bound = 1.0 / jnp.sqrt(fan_in)
        w = jax.random.uniform(kw, (fan_in, fan_out), jnp.float32, -bound, bound)
        b = jax.random.uniform(kb, (1, fan_out), jnp.float32, -bound, bound)
        return w, b

    w1, b1 = lin(ks[0], ks[1], obs_size, hidden)       # feature layer 1 (shared)
    w2, b2 = lin(ks[2], ks[3], hidden, hidden)         # feature layer 2 (shared)
    w3, b3 = lin(ks[4], ks[5], hidden, hidden)         # policy head Linear(64, 64)
    w4, b4 = lin(ks[6], ks[7], hidden, action_size)    # policy head Linear(64, A)
    w5, b5 = lin(ks[8], ks[9], hidden, hidden)         # value head Linear(64, 64)
    w6, b6 = lin(ks[10], ks[11], hidden, 1)            # value head Linear(64, 1)
    return (w1, b1, w2, b2, w3, b3, w4, b4, w5, b5, w6, b6)


def reference_f32(x, params):
    """Plain f32, unfolded reference == PyTorch module semantics."""
    (w1, b1, w2, b2, w3, b3, w4, b4, w5, b5, w6, b6) = params
    h = jnp.tanh(x @ w1 + b1)
    h = jnp.tanh(h @ w2 + b2)
    logits = (h @ w3 + b3) @ w4 + b4
    value = (h @ w5 + b5) @ w6 + b6
    return logits, value


def reference_quantized(x, fused, action_size):
    """Same bf16 quantization / folding as the kernel, computed with jnp in f32."""
    w1, b1, w2, b2, wh, bh = fused
    f32 = jnp.float32
    xq = x.astype(jnp.bfloat16).astype(f32)
    h = jnp.tanh(xq @ w1.astype(f32) + b1)
    h = jnp.tanh(h.astype(jnp.bfloat16).astype(f32) @ w2.astype(f32) + b2)
    out = h.astype(jnp.bfloat16).astype(f32) @ wh.astype(f32) + bh
    return out[:, :action_size], out[:, action_size:action_size + 1]


if __name__ == "__main__":
    OBS, ACT, BATCH = 32, 4, 8
    key = jax.random.PRNGKey(0)
    k_x, k_p = jax.random.split(key)
    x = jax.random.normal(k_x, (BATCH, OBS), jnp.float32)
    params = init_params(k_p, OBS, ACT)
    fused, action_size, out_w = fuse_params(params)

    logits, value = ppo_apply(x, fused, action_size=action_size, out_w=out_w,
                              continuous_action=False)
    logits, value = jax.block_until_ready((logits, value))

    assert logits.shape == (BATCH, ACT)
    assert value.shape == (BATCH, 1)

    # Strict check: kernel vs identically-quantized/folded jnp reference.
    ref_l, ref_v = reference_quantized(x, fused, action_size)
    assert jnp.allclose(logits, ref_l, atol=1e-4, rtol=1e-4), "logits mismatch (quantized ref)"
    assert jnp.allclose(value, ref_v, atol=1e-4, rtol=1e-4), "value mismatch (quantized ref)"

    # Loose check: kernel vs plain f32 PyTorch-equivalent reference (bf16 rounding only).
    f32_l, f32_v = reference_f32(x, params)
    assert jnp.allclose(logits, f32_l, atol=5e-2, rtol=5e-2), "logits mismatch (f32 ref)"
    assert jnp.allclose(value, f32_v, atol=5e-2, rtol=5e-2), "value mismatch (f32 ref)"

    # Also exercise the continuous_action epilogue path (head width 2 -> mean, std).
    params_c = init_params(k_p, OBS, 2)
    fused_c, act_c, out_w_c = fuse_params(params_c)
    (mean, std), value_c = ppo_apply(x, fused_c, action_size=act_c, out_w=out_w_c,
                                     continuous_action=True)
    (mean, std), value_c = jax.block_until_ready(((mean, std), value_c))
    assert mean.shape == (BATCH, 1) and std.shape == (BATCH, 1) and value_c.shape == (BATCH, 1)
    assert bool(jnp.all(std > 0)), "std must be positive after exp(clamped log_std)"

    print("KERNEL_OK")
</pallas_src>

<mosaic_0001>
module attributes {stable_mosaic.version = 11 : i64} {
  func.func @ppo_fused_kernel(%arg0: i32, %arg1: memref<8x32xbf16, #tpu.memory_space<vmem>>, %arg2: memref<32x64xbf16, #tpu.memory_space<vmem>>, %arg3: memref<1x64xf32, #tpu.memory_space<vmem>>, %arg4: memref<64x64xbf16, #tpu.memory_space<vmem>>, %arg5: memref<1x64xf32, #tpu.memory_space<vmem>>, %arg6: memref<64x128xbf16, #tpu.memory_space<vmem>>, %arg7: memref<1x128xf32, #tpu.memory_space<vmem>>, %arg8: memref<8x128xf32, #tpu.memory_space<vmem>>) attributes {dimension_semantics = [#tpu.dimension_semantics<parallel>], iteration_bounds = array<i64: 1>, scalar_prefetch = 0 : i64, scratch_operands = 0 : i64, tpu.core_type = #tpu.core_type<tc>, window_params = [{transform_indices = @transform_0, window_bounds = array<i64: 8, 32>}, {pipeline_mode = #tpu.pipeline_mode<synchronous>, transform_indices = @transform_1, window_bounds = array<i64: 32, 64>}, {pipeline_mode = #tpu.pipeline_mode<synchronous>, transform_indices = @transform_2, window_bounds = array<i64: 1, 64>}, {pipeline_mode = #tpu.pipeline_mode<synchronous>, transform_indices = @transform_3, window_bounds = array<i64: 64, 64>}, {pipeline_mode = #tpu.pipeline_mode<synchronous>, transform_indices = @transform_4, window_bounds = array<i64: 1, 64>}, {pipeline_mode = #tpu.pipeline_mode<synchronous>, transform_indices = @transform_5, window_bounds = array<i64: 64, 128>}, {pipeline_mode = #tpu.pipeline_mode<synchronous>, transform_indices = @transform_6, window_bounds = array<i64: 1, 128>}, {transform_indices = @transform_7, window_bounds = array<i64: 8, 128>}]} {
    %c0 = arith.constant 0 : index
    %c0_0 = arith.constant 0 : index
    %0 = vector.load %arg1[%c0, %c0_0] : memref<8x32xbf16, #tpu.memory_space<vmem>>, vector<8x32xbf16>
    %c0_1 = arith.constant 0 : index
    %c0_2 = arith.constant 0 : index
    %1 = vector.load %arg2[%c0_1, %c0_2] : memref<32x64xbf16, #tpu.memory_space<vmem>>, vector<32x64xbf16>
    %cst = arith.constant dense<0.000000e+00> : vector<8x64xf32>
    %2 = tpu.matmul %0, %1, %cst {dimension_numbers = #tpu.dot_dimension_numbers<[1], [0], [0], [1], [0, 0, 1, 1], [], []>} : vector<8x32xbf16>, vector<32x64xbf16>, vector<8x64xf32> -> vector<8x64xf32>
    %c0_3 = arith.constant 0 : index
    %c0_4 = arith.constant 0 : index
    %3 = vector.load %arg3[%c0_3, %c0_4] : memref<1x64xf32, #tpu.memory_space<vmem>>, vector<1x64xf32>
    %4 = vector.broadcast %3 : vector<1x64xf32> to vector<8x64xf32>
    %5 = arith.addf %2, %4 : vector<8x64xf32>
    %6 = math.tanh %5 : vector<8x64xf32>
    %7 = arith.truncf %6 : vector<8x64xf32> to vector<8x64xbf16>
    %c0_5 = arith.constant 0 : index
    %c0_6 = arith.constant 0 : index
    %8 = vector.load %arg4[%c0_5, %c0_6] : memref<64x64xbf16, #tpu.memory_space<vmem>>, vector<64x64xbf16>
    %cst_7 = arith.constant dense<0.000000e+00> : vector<8x64xf32>
    %9 = tpu.matmul %7, %8, %cst_7 {dimension_numbers = #tpu.dot_dimension_numbers<[1], [0], [0], [1], [0, 0, 1, 1], [], []>} : vector<8x64xbf16>, vector<64x64xbf16>, vector<8x64xf32> -> vector<8x64xf32>
    %c0_8 = arith.constant 0 : index
    %c0_9 = arith.constant 0 : index
    %10 = vector.load %arg5[%c0_8, %c0_9] : memref<1x64xf32, #tpu.memory_space<vmem>>, vector<1x64xf32>
    %11 = vector.broadcast %10 : vector<1x64xf32> to vector<8x64xf32>
    %12 = arith.addf %9, %11 : vector<8x64xf32>
    %13 = math.tanh %12 : vector<8x64xf32>
    %14 = arith.truncf %13 : vector<8x64xf32> to vector<8x64xbf16>
    %c0_10 = arith.constant 0 : index
    %c0_11 = arith.constant 0 : index
    %15 = vector.load %arg6[%c0_10, %c0_11] : memref<64x128xbf16, #tpu.memory_space<vmem>>, vector<64x128xbf16>
    %cst_12 = arith.constant dense<0.000000e+00> : vector<8x128xf32>
    %16 = tpu.matmul %14, %15, %cst_12 {dimension_numbers = #tpu.dot_dimension_numbers<[1], [0], [0], [1], [0, 0, 1, 1], [], []>} : vector<8x64xbf16>, vector<64x128xbf16>, vector<8x128xf32> -> vector<8x128xf32>
    %c0_13 = arith.constant 0 : index
    %c0_14 = arith.constant 0 : index
    %17 = vector.load %arg7[%c0_13, %c0_14] : memref<1x128xf32, #tpu.memory_space<vmem>>, vector<1x128xf32>
    %18 = vector.broadcast %17 : vector<1x128xf32> to vector<8x128xf32>
    %19 = arith.addf %16, %18 : vector<8x128xf32>
    %c0_15 = arith.constant 0 : index
    %c0_16 = arith.constant 0 : index
    %20 = vector.load %arg8[%c0_15, %c0_16] : memref<8x128xf32, #tpu.memory_space<vmem>>, vector<8x128xf32>
    tpu.vector_store %arg8[%c0_15, %c0_16], %19 {strides = array<i32>} : memref<8x128xf32, #tpu.memory_space<vmem>>, vector<8x128xf32>,
    return
  }
  func.func @transform_0(%arg0: i32) -> (i32, i32) {
    %c0_i32 = arith.constant 0 : i32
    %c0_i32_0 = arith.constant 0 : i32
    return %arg0, %c0_i32 : i32, i32
  }
  func.func @transform_1(%arg0: i32) -> (i32, i32) {
    %c0_i32 = arith.constant 0 : i32
    %c0_i32_0 = arith.constant 0 : i32
    %c0_i32_1 = arith.constant 0 : i32
    return %c0_i32, %c0_i32_0 : i32, i32
  }
  func.func @transform_2(%arg0: i32) -> (i32, i32) {
    %c0_i32 = arith.constant 0 : i32
    %c0_i32_0 = arith.constant 0 : i32
    %c0_i32_1 = arith.constant 0 : i32
    return %c0_i32, %c0_i32_0 : i32, i32
  }
  func.func @transform_3(%arg0: i32) -> (i32, i32) {
    %c0_i32 = arith.constant 0 : i32
    %c0_i32_0 = arith.constant 0 : i32
    %c0_i32_1 = arith.constant 0 : i32
    return %c0_i32, %c0_i32_0 : i32, i32
  }
  func.func @transform_4(%arg0: i32) -> (i32, i32) {
    %c0_i32 = arith.constant 0 : i32
    %c0_i32_0 = arith.constant 0 : i32
    %c0_i32_1 = arith.constant 0 : i32
    return %c0_i32, %c0_i32_0 : i32, i32
  }
  func.func @transform_5(%arg0: i32) -> (i32, i32) {
    %c0_i32 = arith.constant 0 : i32
    %c0_i32_0 = arith.constant 0 : i32
    %c0_i32_1 = arith.constant 0 : i32
    return %c0_i32, %c0_i32_0 : i32, i32
  }
  func.func @transform_6(%arg0: i32) -> (i32, i32) {
    %c0_i32 = arith.constant 0 : i32
    %c0_i32_0 = arith.constant 0 : i32
    %c0_i32_1 = arith.constant 0 : i32
    return %c0_i32, %c0_i32_0 : i32, i32
  }
  func.func @transform_7(%arg0: i32) -> (i32, i32) {
    %c0_i32 = arith.constant 0 : i32
    %c0_i32_0 = arith.constant 0 : i32
    return %arg0, %c0_i32 : i32, i32
  }
}

</mosaic_0001>

<bundles_post_ra>
// kernel: ppo_forward.1
= control target key start
LH: loop header
LB: loop body
LE: loop exit
PB: predicated region body
PF: predicated region fallthrough
CT: control target
= control target key end

     0   :  { %12 = vsyncpa [#allocation3], 0  ;;  %s521_s0 = inlined_call_operand.vmem [shape: bf16[8,32], index: 0, kind: input, shape index: {}]   ;;  %s522_s1 = inlined_call_operand.vmem [shape: bf16[32,64], index: 1, kind: input, shape index: {}]   ;;  %s523_s2 = inlined_call_operand.vmem [shape: f32[1,64], index: 2, kind: input, shape index: {}]   ;;  %s524_s3 = inlined_call_operand.hbm [shape: bf16[64,64], index: 3, kind: input, shape index: {}]   ;;  %s525_s4 = inlined_call_operand.vmem [shape: f32[1,64], index: 4, kind: input, shape index: {}]   ;;  %s526_s5 = inlined_call_operand.hbm [shape: bf16[64,128], index: 5, kind: input, shape index: {}]   ;;  %s527_s6 = inlined_call_operand.vmem [shape: f32[1,128], index: 6, kind: input, shape index: {}]   ;;  %s528_s7 = inlined_call_operand.vmem [shape: f32[8,128], index: 7, kind: output, shape index: {}]  }
   0x1   :  { %13 = vsyncpa [#allocation5], 0  ;;  %s428_s24 = smov [#allocation2]   ;;  %s380_s28 = scalar_lea.hbm %s524_s3, 512 }
   0x2   :  { %s25_s25 = sshll.u32 %s428_s24, 4  ;;  %p381_p0 = scmp.ne.s32.totalorder %s524_s3, %s380_s28  ;;  %s26_s25 = int_to_ptr.vmem [resolvable:$true] %s25_s25 }
   0x3   :  { %p384_p1 = scmp.lt.u32.totalorder %s380_s28, %s524_s3 }
   0x5   :  { %p386_p2 = pnand %p384_p1, %p381_p0 }
   0x7   :  { %389 = shalt.err (!%p386_p2)
}
   0x8   :  { %s390_s10 = scalar_lea.vmem %s26_s25, 512  ;;  %p395_p4 = scmp.lt.s32.totalorder %s26_s25, %s26_s25 }
   0x9   :  { %p391_p3 = scmp.ne.s32.totalorder %s26_s25, %s390_s10  ;;  %p396_p5 = scmp.lt.s32.totalorder %s390_s10, %s390_s10 }
   0xb   :  { %p397_p6 = por %p396_p5, %p395_p4 }
   0xd   :  { %p398_p7 = pnand %p397_p6, %p391_p3 }
   0xf   :  { %401 = shalt.err (!%p398_p7)
}
  0x10   :  { %s429_s11 = smov 64   ;;  %s430_s12 = smov 4  }
  0x11   :  { %31 = dma.hbm_to_vmem [thread:$0]  %s524_s3, 512, %s26_s25, [#allocation3], %s429_s11, %s429_s11, %s430_s12  }
  0x12   :  { %s431_s15 = smov [#allocation4]   ;;  %s402_s19 = scalar_lea.hbm %s526_s5, 512 }
  0x13   :  { %s39_s16 = sshll.u32 %s431_s15, 4  ;;  %p403_p8 = scmp.ne.s32.totalorder %s526_s5, %s402_s19  ;;  %s40_s16 = int_to_ptr.vmem [resolvable:$true] %s39_s16 }
  0x14   :  { %p406_p9 = scmp.lt.u32.totalorder %s402_s19, %s526_s5 }
  0x16   :  { %p408_p10 = pnand %p406_p9, %p403_p8 }
  0x18   :  { %411 = shalt.err (!%p408_p10)
}
  0x19   :  { %s412_s24 = scalar_lea.vmem %s40_s16, 512  ;;  %p417_p12 = scmp.lt.s32.totalorder %s40_s16, %s40_s16 }
  0x1a   :  { %p413_p11 = scmp.ne.s32.totalorder %s40_s16, %s412_s24  ;;  %p418_p13 = scmp.lt.s32.totalorder %s412_s24, %s412_s24 }
  0x1c   :  { %p419_p0 = por %p418_p13, %p417_p12 }
  0x1e   :  { %p420_p1 = pnand %p419_p0, %p413_p11 }
  0x20   :  { %423 = shalt.err (!%p420_p1)
}
  0x21   :  { %45 = dma.hbm_to_vmem [thread:$0]  %s526_s5, 512, %s40_s16, [#allocation5], %s429_s11, %s429_s11, %s430_s12  }
  0x22   :  { %424 = dma.done.wait [#allocation3], 512  }
  0x23   :  { %425 = vsyncadd [#allocation3], 4294966784 }
  0x24   :  { %426 = dma.done.wait [#allocation5], 512  }
  0x25   :  { %427 = vsyncadd [#allocation5], 4294966784  ;;  %v432_v0 = vmov 0.0   ;;  %vm433_vm0 = vmmov 0   ;;  %v366_v1 = vld [vmem:[%s522_s1] sm:$0xff]   ;;  %v367_v2 = vld [vmem:[%s522_s1 + $0x8] sm:$0xff]  }
  0x26   :  { %328 = vmatprep.subr.bf16.mxu0 %v432_v0  ;;  %332 = vmatprep.mubr.msk.bf16.mxu0 %vm433_vm0, %v432_v0  ;;  %vm79_vm1 = vcmask 261120   ;;  %v55_v3 = vld [vmem:[%s521_s0] sm:$0xf]  ;;  %v369_v5 = vld [vmem:[#allocation2 + $0x8] sm:$0xff]   ;;  %v370_v6 = vld [vmem:[#allocation2 + $0x10] sm:$0xff]   ;;  %vm164_vm2 = vcmask 523264  }
  0x27   :  { %336 = vmatprep.subr.bf16.mxu1 %v432_v0  ;;  %344 = vmatprep.mubr.msk.bf16.mxu1 %vm433_vm0, %v432_v0  ;;  %v368_v4 = vld [vmem:[#allocation2] sm:$0xff]   ;;  %v371_v7 = vld [vmem:[#allocation2 + $0x18] sm:$0xff]   ;;  %v373_v17 = vld [vmem:[#allocation4 + $0x8] sm:$0xff]  }
  0x28   :  { %329 = vmatpush3.bf16.msra.mxu0 %v366_v1  ;;  %337 = vmatpush3.bf16.msra.mxu1 %v368_v4  ;;  %v299_v8 = vld [vmem:[%s523_s2] ss:$0 sm:$0xff]  ;;  %v374_v18 = vld [vmem:[#allocation4 + $0x10] sm:$0xff]   ;;  %v375_v19 = vld [vmem:[#allocation4 + $0x18] sm:$0xff]  }
  0x29   :  { %330 = vmatprep.subr.bf16.mxu0 %v432_v0  ;;  %338 = vmatprep.subr.bf16.mxu1 %v432_v0  ;;  %v372_v16 = vld [vmem:[#allocation4] sm:$0xff]  }
  0x2a   :  { %v303_v20 = vld [vmem:[%s525_s4] ss:$0 sm:$0xff] }
  0x2b   :  { %v309_v28 = vld [vmem:[%s527_s6] ss:$0 sm:$0xff] }
  0x2c   :  { %331 = vmatpush3.bf16.msra.mxu0 %v367_v2  ;;  %339 = vmatpush3.bf16.msra.mxu1 %v369_v5 }
  0x2d   :  { %348 = vmatprep.subr.bf16.mxu0 %v432_v0  ;;  %340 = vmatprep.subr.bf16.mxu1 %v432_v0 }
  0x2f   :  { %333 = vmatmul.mubr.msk.bf16.vlgmr.msra.gmra.mrb[0].mxu0 %vm79_vm1, %v55_v3 }
  0x30   :  { %356 = vmatprep.mubr.msk.bf16.mxu0 %vm433_vm0, %v432_v0  ;;  %341 = vmatpush3.bf16.msra.mxu1 %v370_v6 }
  0x31   :  { %342 = vmatprep.subr.bf16.mxu1 %v432_v0  ;;  %349 = vmatpush3.bf16.msra.mxu0 %v372_v16 }
  0x32   :  { %350 = vmatprep.subr.bf16.mxu0 %v432_v0 }
  0x34   :  { %343 = vmatpush3.bf16.msra.mxu1 %v371_v7 }
  0x35   :  { %351 = vmatpush3.bf16.msra.mxu0 %v373_v17 }
  0x36   :  { %352 = vmatprep.subr.bf16.mxu0 %v432_v0 }
  0x39   :  { %353 = vmatpush3.bf16.msra.mxu0 %v374_v18 }
  0x3a   :  { %354 = vmatprep.subr.bf16.mxu0 %v432_v0 }
  0x3d   :  { %355 = vmatpush3.bf16.msra.mxu0 %v375_v19 }
 0x102   :  { %v117_v9 = vpop.f32.mrb[0].mxu0 }
 0x103   :  { %v118_v10 = vadd.f32 %v299_v8, %v117_v9  ;;  %v334_v11 = vpop.f32.mrb[1].mxu0 }
 0x104   :  { %v120_v12 = vpop.f32.mrb[2].mxu0 }
 0x105   :  { %376 = vtanh.f32 %v118_v10  ;;  %v335_v13 = vpop.f32.mrb[3].mxu0 }
 0x10f   :  { %v377_v14 = vpop.eup %376 }
 0x110   :  { %v124_v15 = vpack.c.bf16 %v377_v14, %v377_v14 }
 0x112   :  { %345 = vmatmul.mubr.msk.bf16.vlgmr.msra.gmra.mrb[0].mxu1 %vm164_vm2, %v124_v15 }
 0x1e5   :  { %v202_v21 = vpop.f32.mrb[0].mxu1 }
 0x1e6   :  { %v203_v22 = vadd.f32 %v303_v20, %v202_v21  ;;  %v346_v23 = vpop.f32.mrb[1].mxu1 }
 0x1e7   :  { %v205_v24 = vpop.f32.mrb[2].mxu1 }
 0x1e8   :  { %378 = vtanh.f32 %v203_v22  ;;  %v347_v25 = vpop.f32.mrb[3].mxu1 }
 0x1f2   :  { %v379_v26 = vpop.eup %378 }
 0x1f3   :  { %v209_v27 = vpack.c.bf16 %v379_v26, %v379_v26 }
 0x1f5   :  { %357 = vmatmul.mubr.msk.bf16.vlgmr.msra.gmra.mrb[4].mxu0 %vm164_vm2, %v209_v27 }
 0x2c8   :  { %v286_v29 = vpop.f32.mrb[4].mxu0 }
 0x2c9   :  { %v287_v30 = vadd.f32 %v309_v28, %v286_v29  ;;  %v358_v31 = vpop.f32.mrb[5].mxu0 }
 0x2ca   :  { %v289_v32 = vpop.f32.mrb[6].mxu0 }
 0x2cb   :  { %292 = vst [vmem:[%s528_s7] sm:$0xff] %v287_v30  ;;  %v359_v33 = vpop.f32.mrb[7].mxu0 }
 0x2cc   :  { %297 = vsyncpa [#allocation3], 1 }
 0x2cd   :  { %298 = vsyncpa [#allocation5], 1 }

</bundles_post_ra>
